<compile_context>
chip_gen: v6e
topology: v6e:2x2x1
jax: 0.10.0
libtpu: 0.0.40
codegen_flags: <defaults>
</compile_context>

<pallas_src>
import functools

import jax
import jax.numpy as jnp
from jax.experimental import pallas as pl
from jax.experimental.pallas import tpu as pltpu


def _round_up(n, m):
    return -(-n // m) * m


def _sse_kernel(x_ref, t_ref, out_ref, acc_ref, *, block_rows):
    """Accumulates sum((x - t)^2) per core into a VMEM vector accumulator."""
    i = pl.program_id(1)

    @pl.when(i == 0)
    def _():
        acc_ref[...] = jnp.zeros_like(acc_ref)

    d = x_ref[...].astype(jnp.float32) - t_ref[...].astype(jnp.float32)
    acc_ref[...] += d * d  # VPU-only steady state

    @pl.when(i == pl.num_programs(1) - 1)
    def _():
        # Single partial reduce per core: collapse sublanes to an (1, 8, 128) block.
        out_ref[...] = acc_ref[...].reshape(block_rows // 8, 8, 128).sum(
            axis=0, keepdims=True)


def content_loss_forward(x, target, *, block_rows=1024, core_split=2):
    """Mirrors ContentLoss.forward: returns (input, loss) with
    loss = mean((input - target)**2). The input is passed through unchanged."""
    assert x.shape == target.shape, "input / target shape mismatch"
    lanes = 128
    total = int(x.size)
    itemsize = jnp.dtype(x.dtype).itemsize
    # dtype-correct sublane multiple: 8 for f32, 16 for bf16, 32 for int8/fp8
    sub = max(8, 32 // itemsize)

    rows = pl.cdiv(total, lanes)
    block_rows = _round_up(min(block_rows, _round_up(rows, sub)), sub)
    chunk = core_split * block_rows
    padded_rows = _round_up(rows, chunk)
    steps_per_core = padded_rows // chunk

    # Zero-pad both operands: padded elements have diff 0 -> contribute nothing to the sum.
    pad = padded_rows * lanes - total
    xf = x.reshape(-1)
    tf = target.reshape(-1)
    if pad:
        xf = jnp.pad(xf, (0, pad))
        tf = jnp.pad(tf, (0, pad))
    x2 = xf.reshape(padded_rows, lanes)
    t2 = tf.reshape(padded_rows, lanes)

    # VMEM budget: 2 inputs x 2 pipeline buffers x tile + f32 accumulator (+ headroom).
    tile_bytes = block_rows * lanes * itemsize
    acc_bytes = block_rows * lanes * 4
    vmem_need = 2 * 2 * tile_bytes + acc_bytes + (1 << 20)
    vmem_limit = int(min(max(2 * vmem_need, 16 << 20), 32 << 20))

    kernel = functools.partial(_sse_kernel, block_rows=block_rows)

    partials = pl.pallas_call(
        kernel,
        out_shape=jax.ShapeDtypeStruct((core_split, 8, lanes), jnp.float32),
        grid_spec=pltpu.PrefetchScalarGridSpec(
            num_scalar_prefetch=0,
            grid=(core_split, steps_per_core),
            in_specs=[
                pl.BlockSpec((block_rows, lanes),
                             lambda c, i: (c * steps_per_core + i, 0)),
                pl.BlockSpec((block_rows, lanes),
                             lambda c, i: (c * steps_per_core + i, 0)),
            ],
            out_specs=pl.BlockSpec((1, 8, lanes), lambda c, i: (c, 0, 0)),
            scratch_shapes=[pltpu.VMEM((block_rows, lanes), jnp.float32)],
        ),
        compiler_params=pltpu.CompilerParams(
            dimension_semantics=("parallel", "arbitrary"),
            vmem_limit_bytes=vmem_limit,
        ),
        cost_estimate=pl.CostEstimate(
            flops=3 * total,
            transcendentals=0,
            bytes_accessed=2 * total * itemsize + core_split * 8 * lanes * 4,
        ),
    )(x2, t2)

    # Final cross-lane/core reduction + mean scale (tiny; done in XLA).
    loss = jnp.sum(partials) / jnp.float32(total)

    # Module forward returns the input unchanged (identity pass-through);
    # the loss is the stored side value (self.loss in the PyTorch module).
    return x, loss


if __name__ == "__main__":
    key = jax.random.PRNGKey(0)
    kx, kt = jax.random.split(key)

    # NCHW, matching the PyTorch conv-feature-map convention.
    x = jax.random.normal(kx, (2, 4, 16, 16), dtype=jnp.float32)
    # Deterministic synthetic "target" feature map (stands in for target.detach()).
    target = jax.random.normal(kt, (2, 4, 16, 16), dtype=jnp.float32)

    out, loss = content_loss_forward(x, target)
    out = jax.block_until_ready(out)
    loss = jax.block_until_ready(loss)

    ref_loss = jnp.mean((x - target) ** 2)
    assert jnp.allclose(loss, ref_loss, rtol=1e-5, atol=1e-6), (loss, ref_loss)
    assert jnp.array_equal(out, x)

    print("KERNEL_OK")
</pallas_src>

<mosaic_0001>
module attributes {stable_mosaic.version = 11 : i64} {
  func.func @_sse_kernel(%arg0: i32, %arg1: i32, %arg2: memref<16x128xf32, #tpu.memory_space<vmem>>, %arg3: memref<16x128xf32, #tpu.memory_space<vmem>>, %arg4: memref<1x8x128xf32, #tpu.memory_space<vmem>>, %arg5: memref<16x128xf32, #tpu.memory_space<vmem>>) attributes {dimension_semantics = [#tpu.dimension_semantics<parallel>, #tpu.dimension_semantics<arbitrary>], iteration_bounds = array<i64: 2, 1>, scalar_prefetch = 0 : i64, scratch_operands = 1 : i64, tpu.core_type = #tpu.core_type<tc>, window_params = [{transform_indices = @transform_0, window_bounds = array<i64: 16, 128>}, {transform_indices = @transform_1, window_bounds = array<i64: 16, 128>}, {transform_indices = @transform_2, window_bounds = array<i64: 1, 8, 128>}]} {
    %c0_i32 = arith.constant 0 : i32
    %0 = arith.cmpi eq, %arg1, %c0_i32 : i32
    %1 = arith.extui %0 : i1 to i32
    %c0_i32_0 = arith.constant 0 : i32
    %2 = arith.cmpi ne, %1, %c0_i32_0 : i32
    scf.if %2 {
      %cst = arith.constant 0.000000e+00 : f32
      %13 = vector.broadcast %cst : f32 to vector<16x128xf32>
      %c0_10 = arith.constant 0 : index
      %c0_11 = arith.constant 0 : index
      %14 = vector.load %arg5[%c0_10, %c0_11] : memref<16x128xf32, #tpu.memory_space<vmem>>, vector<16x128xf32>
      tpu.vector_store %arg5[%c0_10, %c0_11], %13 {strides = array<i32>} : memref<16x128xf32, #tpu.memory_space<vmem>>, vector<16x128xf32>,
    } else {
    }
    %c0 = arith.constant 0 : index
    %c0_1 = arith.constant 0 : index
    %3 = vector.load %arg2[%c0, %c0_1] : memref<16x128xf32, #tpu.memory_space<vmem>>, vector<16x128xf32>
    %c0_2 = arith.constant 0 : index
    %c0_3 = arith.constant 0 : index
    %4 = vector.load %arg3[%c0_2, %c0_3] : memref<16x128xf32, #tpu.memory_space<vmem>>, vector<16x128xf32>
    %5 = arith.subf %3, %4 : vector<16x128xf32>
    %c0_4 = arith.constant 0 : index
    %c0_5 = arith.constant 0 : index
    %6 = vector.load %arg5[%c0_4, %c0_5] : memref<16x128xf32, #tpu.memory_space<vmem>>, vector<16x128xf32>
    %7 = arith.mulf %5, %5 : vector<16x128xf32>
    %8 = arith.addf %6, %7 : vector<16x128xf32>
    %c0_6 = arith.constant 0 : index
    %c0_7 = arith.constant 0 : index
    %9 = vector.load %arg5[%c0_6, %c0_7] : memref<16x128xf32, #tpu.memory_space<vmem>>, vector<16x128xf32>
    tpu.vector_store %arg5[%c0_6, %c0_7], %8 {strides = array<i32>} : memref<16x128xf32, #tpu.memory_space<vmem>>, vector<16x128xf32>,
    %c0_i32_8 = arith.constant 0 : i32
    %10 = arith.cmpi eq, %arg1, %c0_i32_8 : i32
    %11 = arith.extui %10 : i1 to i32
    %c0_i32_9 = arith.constant 0 : i32
    %12 = arith.cmpi ne, %11, %c0_i32_9 : i32
    scf.if %12 {
      %c0_10 = arith.constant 0 : index
      %c0_11 = arith.constant 0 : index
      %13 = vector.load %arg5[%c0_10, %c0_11] : memref<16x128xf32, #tpu.memory_space<vmem>>, vector<16x128xf32>
      %14 = vector.shape_cast %13 : vector<16x128xf32> to vector<2x8x128xf32>
      %cst = arith.constant dense<0.000000e+00> : vector<8x128xf32>
      %15 = vector.multi_reduction <add>, %14, %cst [0] : vector<2x8x128xf32> to vector<8x128xf32>
      %16 = vector.shape_cast %15 : vector<8x128xf32> to vector<1x8x128xf32>
      %c0_12 = arith.constant 0 : index
      %c0_13 = arith.constant 0 : index
      %c0_14 = arith.constant 0 : index
      %17 = vector.load %arg4[%c0_12, %c0_13, %c0_14] : memref<1x8x128xf32, #tpu.memory_space<vmem>>, vector<1x8x128xf32>
      tpu.vector_store %arg4[%c0_12, %c0_13, %c0_14], %16 {strides = array<i32>} : memref<1x8x128xf32, #tpu.memory_space<vmem>>, vector<1x8x128xf32>,
    } else {
    }
    return
  }
  func.func @transform_0(%arg0: i32, %arg1: i32) -> (i32, i32) {
    %c1_i32 = arith.constant 1 : i32
    %0 = arith.muli %arg0, %c1_i32 : i32
    %1 = arith.addi %0, %arg1 : i32
    %c0_i32 = arith.constant 0 : i32
    %c0_i32_0 = arith.constant 0 : i32
    return %1, %c0_i32 : i32, i32
  }
  func.func @transform_1(%arg0: i32, %arg1: i32) -> (i32, i32) {
    %c1_i32 = arith.constant 1 : i32
    %0 = arith.muli %arg0, %c1_i32 : i32
    %1 = arith.addi %0, %arg1 : i32
    %c0_i32 = arith.constant 0 : i32
    %c0_i32_0 = arith.constant 0 : i32
    return %1, %c0_i32 : i32, i32
  }
  func.func @transform_2(%arg0: i32, %arg1: i32) -> (i32, i32, i32) {
    %c0_i32 = arith.constant 0 : i32
    %c0_i32_0 = arith.constant 0 : i32
    %c0_i32_1 = arith.constant 0 : i32
    return %arg0, %c0_i32, %c0_i32_0 : i32, i32, i32
  }
}

</mosaic_0001>

<bundles_post_ra>
// kernel: tpu_custom_call.1
= control target key start
LH: loop header
LB: loop body
LE: loop exit
PB: predicated region body
PF: predicated region fallthrough
CT: control target
= control target key end

     0   :  { %7 = vsyncpa [#allocation4], 0  ;;  %s787_s0 = inlined_call_operand.hbm [shape: f32[32,128], index: 0, kind: input, shape index: {}]   ;;  %s788_s1 = inlined_call_operand.hbm [shape: f32[32,128], index: 1, kind: input, shape index: {}]   ;;  %s789_s2 = inlined_call_operand.hbm [shape: f32[2,8,128], index: 2, kind: output, shape index: {}]  }
   0x1   :  { %9 = vsyncpa [#allocation4 + $0x1], 0 }
   0x2   :  { %10 = vsyncpa [#allocation7], 0 }
   0x3   :  { %12 = vsyncpa [#allocation7 + $0x1], 0 }
   0x4   :  { %13 = vsyncpa [#allocation5], 0 }
   0x5   :  { %15 = vsyncpa [#allocation5 + $0x1], 0  ;;  %s619_s9 = smov 0   ;;  %s621_s10 = smov 0  }
   0x6   :  { %s623_s11 = smov 0   ;;  %s625_s12 = smov 0  }
   0x7   :  { %s627_s13 = smov 0   ;;  %s629_s14 = smov 0  }
   0x8 LB: > { %s368_s15 = sadd.s32 4294967295, %s597_s14   ;;  %s369_s16 = sadd.s32 4294967294, %s597_s14   ;;  %s597_s14 = sphi %s629_s14, %s21_s14   ;;  %s593_s13 = sphi %s627_s13, %s801_s13   ;;  %s589_s12 = sphi %s625_s12, %s800_s12   ;;  %s585_s11 = sphi %s623_s11, %s799_s11   ;;  %s581_s10 = sphi %s621_s10, %s798_s10   ;;  %s577_s9 = sphi %s619_s9, %s797_s9  }
   0x9   : > { %s33_s17 = sadd.s32 1, %s593_s13  ;;  %s42_s18 = sadd.s32 1, %s585_s11 }
   0xa   : > { %p35_p0 = scmp.ge.s32.totalorder %s33_s17, 2  ;;  %p49_p1 = scmp.ne.s32.totalorder %s585_s11, %s581_s10 }
   0xb   : > { %p50_p2 = scmp.eq.s32.totalorder %s597_s14, 0  ;;  %p55_p3 = scmp.ne.s32.totalorder %s581_s10, %s577_s9 }
   0xc   : > { %s803_s17 = smov (%p35_p0, %s33_s17), 0  ;;  %p56_p5 = scmp.eq.s32.totalorder %s368_s15, 0 }
   0xd   : > { %p660_p4 = por %p50_p2, %p49_p1  ;;  %s39_s20 = ssub.s32 %s593_s13, %s803_s17 }
   0xe   : > { %p107_p6 = scmp.eq.s32.totalorder %s368_s15, 1  ;;  %p40_p7 = scmp.eq.s32.totalorder %s39_s20, 0 }
   0xf   : > { %p666_p8 = por %p56_p5, %p55_p3  ;;  %p113_p10 = scmp.eq.s32.totalorder %s369_s16, 1 }
  0x10   : > { %p670_p9 = por %p107_p6, %p49_p1  ;;  %p405_p13 = scmp.lt.s32.totalorder %s597_s14, 2 }
  0x11   : > { %s675_s23 = scalar_select %p40_p7, %s585_s11, %s42_s18  }
  0x12   : > { %p677_p11 = por %p113_p10, %p55_p3  ;;  %s684_s25 = sand.u32 1, %s585_s11  }
  0x13   : > { %s372_s26 = sshll.u32 %s684_s25, 4  ;;  %s386_s27 = sshll.u32 %s593_s13, 8 }
  0x14   : > { %s144_s30 = scalar_lea.hbm %s787_s0, %s386_s27  ;;  %s137_s3 = scalar_lea.vmem [#allocation3], %s372_s26 }
  0x15   : > { %s145_s4 = sshll.u32 %s137_s3, 4  ;;  %p697_p0 = pnand %p405_p13, %p660_p4  ;;  %s146_s4 = int_to_ptr.vmem [resolvable:$true] %s145_s4 }
  0x16   : > { %p378_p1 = scmp.ge.s32.totalorder %s597_s14, 1  ;;  %s134_s6 = scalar_lea.sflag [#allocation4], %s684_s25 }
  0x17   : > { %p459_p2 = pneg %p697_p0  ;;  %s470_s7 = scalar_lea.vmem %s146_s4, 256 }
  0x18   : > { %p471_p3 = scmp.ne.s32.totalorder %s146_s4, %s470_s7  ;;  %s599_s8 = smov [#allocation3]  }
  0x19   : > { %s475_s15 = sshll.u32 %s599_s8, 4  ;;  %s476_s15 = int_to_ptr.vmem [resolvable:$false] %s475_s15 }
  0x1a   : > { %p473_p5 = pnand %p471_p3, %p459_p2  ;;  %s477_s16 = scalar_lea.vmem %s476_s15, 512 }
  0x1b   : > { %p478_p4 = scmp.lt.s32.totalorder %s146_s4, %s476_s15  ;;  %p479_p7 = scmp.lt.s32.totalorder %s477_s16, %s470_s7 }
  0x1c   : > { %p474_p6 = pneg %p473_p5 }
  0x1d   : > { %p480_p10 = por %p479_p7, %p478_p4 }
  0x1f   : > { %p481_p13 = pnand %p480_p10, %p474_p6 }
  0x21   : > { %484 = shalt.err (!%p481_p13)
}
  0x22   : > { %s600_s18 = smov 128   ;;  %s601_s19 = smov 8  }
  0x23   : > { %397 = dma.hbm_to_vmem [thread:$0]  (!%p697_p0), %s144_s30, 256, %s146_s4, %s134_s6, %s600_s18, %s600_s18, %s601_s19  }
  0x24   : > { %p175_p3 = scmp.lt.s32.totalorder %s597_s14, 3  ;;  %s166_s29 = scalar_lea.hbm %s788_s1, %s386_s27 }
  0x25   : > { %s159_s7 = scalar_lea.vmem [#allocation6], %s372_s26  ;;  %s156_s15 = scalar_lea.sflag [#allocation7], %s684_s25 }
  0x26   : > { %p718_p5 = pnand %p378_p1, %p175_p3  ;;  %s167_s8 = sshll.u32 %s159_s7, 4  ;;  %s168_s8 = int_to_ptr.vmem [resolvable:$true] %s167_s8 }
  0x27   : > { %s498_s16 = scalar_lea.vmem %s168_s8, 256  ;;  %s602_s30 = smov [#allocation6]  }
  0x28   : > { %p499_p6 = scmp.ne.s32.totalorder %s168_s8, %s498_s16  ;;  %s503_s4 = sshll.u32 %s602_s30, 4  ;;  %s504_s4 = int_to_ptr.vmem [resolvable:$false] %s503_s4 }
  0x29   : > { %s505_s27 = scalar_lea.vmem %s504_s4, 512  ;;  %p506_p10 = scmp.lt.s32.totalorder %s168_s8, %s504_s4 }
  0x2a   : > { %p501_p4 = pnand %p499_p6, %p459_p2  ;;  %p507_p1 = scmp.lt.s32.totalorder %s505_s27, %s498_s16 }
  0x2c   : > { %p502_p7 = pneg %p501_p4  ;;  %p508_p13 = por %p507_p1, %p506_p10 }
  0x2e   : > { %p509_p3 = pnand %p508_p13, %p502_p7 }
  0x30   : > { %512 = shalt.err (!%p509_p3)
}
  0x31   : > { %400 = dma.hbm_to_vmem [thread:$0]  (!%p697_p0), %s166_s29, 256, %s168_s8, %s156_s15, %s600_s18, %s600_s18, %s601_s19  }
  0x32   : > { %179 = sbr.rel (%p718_p5) target bundleno = 82 (0x52), region = 28  ;;  %s733_s25 = sand.u32 (!%p718_p5), 1, %s581_s10  }
  0x33   : > { %s379_s26 = sshll.u32 (!%p718_p5), %s733_s25, 4  ;;  %s182_s6 = scalar_lea.sflag (!%p718_p5), [#allocation4], %s733_s25 }
  0x34   : > { %s185_s20 = scalar_lea.vmem (!%p718_p5), [#allocation3], %s379_s26 }
  0x37   : > { %564 = dma.done.wait (%p666_p8), %s182_s6, 256  }
  0x38   : > { %566 = vsyncadd (%p666_p8), %s182_s6, 4294967040  ;;  %s191_s5 = scalar_lea.sflag [#allocation7], %s733_s25  ;;  %s194_s18 = scalar_lea.vmem [#allocation6], %s379_s26 }
  0x39   : > { %568 = dma.done.wait (%p666_p8), %s191_s5, 256  }
  0x3a   : > { %570 = vsyncadd (%p666_p8), %s191_s5, 4294967040  ;;  %s381_s19 = sshll.u32 %s733_s25, 3  ;;  %v230_v0 = vld [vmem:[%s185_s20] sm:$0xff]  ;;  %v231_v1 = vld [vmem:[%s185_s20 + $0x8] sm:$0xff]  ;;  %s383_s3 = sshll.u32 %s589_s12, 7 }
  0x3b   : > { %v232_v2 = vld [vmem:[%s194_s18] sm:$0xff]  ;;  %v233_v3 = vld [vmem:[%s194_s18 + $0x8] sm:$0xff]  ;;  %s219_s28 = scalar_lea.vmem [#allocation8], %s381_s19  ;;  %s263_s8 = scalar_lea.hbm %s789_s2, %s383_s3 }
  0x3c   : > { %v234_v4 = vsub.f32 %v230_v0, %v232_v2  ;;  %v235_v5 = vsub.f32 %v231_v1, %v233_v3  ;;  %s265_s29 = sshll.u32 %s219_s28, 4  ;;  %s252_s15 = scalar_lea.sflag [#allocation5], %s733_s25  ;;  %s266_s29 = int_to_ptr.vmem [resolvable:$true] %s265_s29 }
  0x3d   : > { %s513_s16 = scalar_lea.vmem %s266_s29, 128  ;;  %s603_s30 = smov [#allocation8]  }
  0x3e   : > { %v238_v6 = vmul.f32 %v234_v4, %v234_v4  ;;  %v239_v7 = vmul.f32 %v235_v5, %v235_v5  ;;  %p514_p8 = scmp.ne.s32.totalorder %s266_s29, %s513_s16  ;;  %s517_s4 = sshll.u32 %s603_s30, 4  ;;  %s518_s4 = int_to_ptr.vmem [resolvable:$false] %s517_s4 }
  0x3f   : > { %s519_s27 = scalar_lea.vmem %s518_s4, 256  ;;  %p520_p5 = scmp.lt.s32.totalorder %s266_s29, %s518_s4 }
  0x40   : > { %v249_v8 = vadd.f32 %v239_v7, %v238_v6  ;;  %p515_p0 = pnand %p514_p8, %p670_p9  ;;  %p521_p6 = scmp.lt.s32.totalorder %s519_s27, %s513_s16 }
  0x42   : > { %250 = vst [vmem:[%s219_s28] sm:$0xff] %v249_v8  ;;  %p516_p2 = pneg %p515_p0  ;;  %p522_p4 = por %p521_p6, %p520_p5 }
  0x44   : > { %p523_p7 = pnand %p522_p4, %p516_p2 }
  0x46   : > { %526 = shalt.err (!%p523_p7)
}
  0x47   : > { %s527_s12 = scalar_lea.hbm %s263_s8, 128  ;;  %s531_s6 = scalar_lea.hbm %s789_s2, 256 }
  0x48   : > { %p528_p10 = scmp.ne.s32.totalorder %s263_s8, %s527_s12  ;;  %p532_p3 = scmp.lt.s32.totalorder %s263_s8, %s789_s2 }
  0x49   : > { %p533_p8 = scmp.lt.s32.totalorder %s531_s6, %s527_s12 }
  0x4a   : > { %p529_p1 = pnand %p528_p10, %p670_p9 }
  0x4b   : > { %p534_p0 = por %p533_p8, %p532_p3 }
  0x4c   : > { %p530_p13 = pneg %p529_p1 }
  0x4e   : > { %p535_p12 = pnand %p534_p0, %p530_p13 }
  0x50   : > { %538 = shalt.err (!%p535_p12)
}
  0x51   : > { %392 = dma.vmem_to_hbm [thread:$0]  (%p670_p9), %s266_s29, 128, %s263_s8, %s252_s15  }
  0x52 PF: > { %s277_s18 = sand.u32 1, %s577_s9   ;;  %p796_p2 = scmp.ge.s32.totalorder %s597_s14, 2 }
  0x53   : > { %s278_s19 = scalar_lea.sflag [#allocation5], %s277_s18 }
  0x54   : > { %p402_p5 = pnand %p796_p2, %p677_p11 }
  0x56   : > { %p403_p6 = pneg %p402_p5 }
  0x58   : > { %572 = dma.done.wait (%p403_p6), %s278_s19, 128  }
  0x59   : > { %574 = vsyncadd (%p403_p6), %s278_s19, 4294967168  ;;  %s21_s14 = sadd.s32 1, %s597_s14   ;;  %s797_s9 = smov %s581_s10 }
  0x5a   : > { %p18_p4 = scmp.ge.s32.totalorder %s21_s14, 4   ;;  %s798_s10 = smov %s585_s11 }
  0x5b   : > { %s799_s11 = smov %s675_s23  ;;  %s800_s12 = smov %s593_s13 }
  0x5c   : > { %s801_s13 = smov %s803_s17  ;;  %20 = sbr.rel (!%p18_p4) target bundleno = 8 (0x8), region = 94 }
  0x61   :  { %283 = vsyncpa [#allocation4], 1 }
  0x62   :  { %285 = vsyncpa [#allocation4 + $0x1], 1 }
  0x63   :  { %286 = vsyncpa [#allocation7], 1 }
  0x64   :  { %288 = vsyncpa [#allocation7 + $0x1], 1 }
  0x65   :  { %289 = vsyncpa [#allocation5], 1 }
  0x66   :  { %291 = vsyncpa [#allocation5 + $0x1], 1 }

</bundles_post_ra>
